<compile_context>
chip_gen: v7x
topology: tpu7x:2x2x1
jax: 0.10.0
libtpu: 0.0.40
codegen_flags: <defaults>
</compile_context>

<pallas_src>
import functools

import numpy as np
import jax
import jax.numpy as jnp
from jax.experimental import pallas as pl
from jax.experimental.pallas import tpu as pltpu


def _cdiv(a, b):
    return -(-a // b)


def _tiled_plane_bytes(h, w, dtype):
    """(sublane,128)-tiled VMEM footprint of one (h, w) plane."""
    itemsize = jnp.dtype(dtype).itemsize
    sublane = max(8, 32 // itemsize)        # 8 for f32, 16 for bf16, 32 for int8
    return (_cdiv(h, sublane) * sublane) * (_cdiv(w, 128) * 128) * itemsize


def _pick_batch_block(n, c, h, w, dtype, *, max_block=64, vmem_budget=36 << 20):
    """Largest per-step batch block whose tiled pipeline footprint fits the budget."""
    per_image = c * _tiled_plane_bytes(h, w, dtype)
    per_image_pipelined = 4 * per_image       # in + out blocks, each double-buffered
    cap = max(1, min(max_block, vmem_budget // per_image_pipelined))
    b_blk = min(n, cap)
    # Prefer an even number of grid steps when the batch spans several blocks, so the
    # two v7x TensorCores split the "parallel" batch axis evenly.  On single-TC chips
    # (v5e / v6e) the possible extra step costs well under a microsecond.
    steps = _cdiv(n, b_blk)
    if steps > 1 and steps % 2 == 1:
        b_blk = max(1, _cdiv(n, steps + 1))
    return b_blk


def _shift_crop_kernel(shift_ref, x_ref, o_ref, *, pad, b_blk, n_total):
    """One grid step == one block of up to `b_blk` images.

    shift_ref: SMEM (2*N,) int32, scalar-prefetched, laid out [sx0, sy0, sx1, sy1, ...].
    x_ref:     VMEM (b_blk, C, H, W) input block.
    o_ref:     VMEM (b_blk, C, H, W) output block.

    out[b, :, i, j] = x[b, :, clamp(i + sy - pad, 0, H-1), clamp(j + sx - pad, 0, W-1)]
    """
    g = pl.program_id(0)
    _, C, H, W = x_ref.shape
    mid_h = H - 2 * pad        # interior output rows: never row-clamped for sy in [0, 2*pad]

    @pl.loop(0, b_blk)
    def _(i):
        n_idx = g * b_blk + i

        @pl.when(n_idx < n_total)                # cdiv-grid tail guard
        def _():
            sx = jnp.clip(shift_ref[2 * n_idx], 0, 2 * pad)
            sy = jnp.clip(shift_ref[2 * n_idx + 1], 0, 2 * pad)

            def copy_rows(dst_r0, n_rows, src_row, dx):
                """Move n_rows source rows (dynamic start) into output rows
                [dst_r0, dst_r0+n_rows) with a static horizontal shift dx and
                replicate-clamped edge columns.  One load + one store for the
                interior columns; the <= pad edge columns come from a broadcast
                of the edge column."""
                if dx >= 0:                       # right edge replicates
                    w_core = W - dx
                    o_ref[i, :, pl.ds(dst_r0, n_rows), pl.ds(0, w_core)] = (
                        x_ref[i, :, pl.ds(src_row, n_rows), pl.ds(dx, w_core)])
                    if dx > 0:
                        edge = x_ref[i, :, pl.ds(src_row, n_rows), pl.ds(W - 1, 1)]
                        o_ref[i, :, pl.ds(dst_r0, n_rows), pl.ds(w_core, dx)] = (
                            jnp.broadcast_to(edge, (C, n_rows, dx)))
                else:                             # left edge replicates
                    adx = -dx
                    w_core = W - adx
                    o_ref[i, :, pl.ds(dst_r0, n_rows), pl.ds(adx, w_core)] = (
                        x_ref[i, :, pl.ds(src_row, n_rows), pl.ds(0, w_core)])
                    edge = x_ref[i, :, pl.ds(src_row, n_rows), pl.ds(0, 1)]
                    o_ref[i, :, pl.ds(dst_r0, n_rows), pl.ds(0, adx)] = (
                        jnp.broadcast_to(edge, (C, n_rows, adx)))

            # The x-shift only takes 2*pad+1 values -> one pl.when branch per static
            # lane offset.  Conditions cover every integer, so no shift value can
            # leave the output unwritten.  Only one branch executes at runtime.
            for k in range(2 * pad + 1):
                if k == 0:
                    cond = sx <= 0
                elif k == 2 * pad:
                    cond = sx >= 2 * pad
                else:
                    cond = sx == k

                @pl.when(cond)
                def _(dx=k - pad):
                    # top `pad` output rows (row-clamped to source row 0 when needed)
                    for r in range(pad):
                        copy_rows(r, 1, jnp.maximum(sy - pad + r, 0), dx)
                    # interior rows: one bulk dynamic-start sublane slice of x_ref
                    copy_rows(pad, mid_h, sy, dx)
                    # bottom `pad` output rows (row-clamped to source row H-1)
                    for r in range(pad):
                        copy_rows(H - pad + r, 1,
                                  jnp.minimum(sy + mid_h + r, H - 1), dx)


def random_shifts_crop(x, shift, pad, *, block_size=None):
    """out[b] = replicate_pad(x[b], pad)[:, sy:sy+H, sx:sx+W] with (sx, sy) = shift[b].

    This is exactly F.grid_sample(F.pad(x, pad, 'replicate'), base_grid + 2*shift/(h+2p))
    for the integer shifts RandomShiftsAug draws.
    """
    n, c, h, w = x.shape
    if pad == 0:
        return x
    assert h > 2 * pad and w > 2 * pad, "pad too large for the image"

    if block_size is None:
        b_blk = _pick_batch_block(n, c, h, w, x.dtype)
    else:
        b_blk = max(1, min(int(block_size), n))
    num_blocks = _cdiv(n, b_blk)

    # Clamp so arbitrary caller-supplied shifts stay in bounds (correctness concern).
    shift_flat = jnp.clip(shift.astype(jnp.int32), 0, 2 * pad).reshape(-1)

    kernel = functools.partial(_shift_crop_kernel, pad=pad, b_blk=b_blk, n_total=n)
    return pl.pallas_call(
        kernel,
        out_shape=jax.ShapeDtypeStruct((n, c, h, w), x.dtype),
        grid_spec=pltpu.PrefetchScalarGridSpec(
            num_scalar_prefetch=1,                         # shift table -> SMEM
            grid=(num_blocks,),
            in_specs=[pl.BlockSpec((b_blk, c, h, w), lambda g, s: (g, 0, 0, 0))],
            out_specs=pl.BlockSpec((b_blk, c, h, w), lambda g, s: (g, 0, 0, 0)),
        ),
        compiler_params=pltpu.CompilerParams(
            dimension_semantics=("parallel",),
            vmem_limit_bytes=48 * 1024 * 1024,             # < 64 MiB physical on v7x
        ),
    )(shift_flat, x)


def random_shifts_aug(x, key, *, img_size=None, disable_aug=False):
    """JAX/Pallas equivalent of RandomShiftsAug.forward (shifts drawn with jax.random)."""
    if disable_aug:
        return x
    n, _, h, w = x.shape
    assert h == w
    pad = int((img_size if img_size is not None else h) / 21)
    if pad == 0:
        return x     # shift is always 0 -> grid_sample reduces to the identity resample
    shift = jax.random.randint(key, (n, 2), 0, 2 * pad + 1, dtype=jnp.int32)
    return random_shifts_crop(x, shift, pad)


if __name__ == "__main__":
    # img_size=32 -> pad = int(32/21) = 1 (non-trivial shifts); N=5 exercises the
    # masked tail when a smaller block size is forced.
    N, C, H, W = 5, 4, 32, 32
    key = jax.random.PRNGKey(0)
    kx, ks = jax.random.split(key)
    x = jax.random.normal(kx, (N, C, H, W), dtype=jnp.float32)

    def ref_crop(x_in, shift_in, pad):
        x_np = np.asarray(x_in)
        s = np.clip(np.asarray(shift_in), 0, 2 * pad)
        xp = np.pad(x_np, ((0, 0), (0, 0), (pad, pad), (pad, pad)), mode="edge")
        hh, ww = x_np.shape[2], x_np.shape[3]
        return np.stack([xp[b, :, s[b, 1]:s[b, 1] + hh, s[b, 0]:s[b, 0] + ww]
                         for b in range(x_np.shape[0])])

    # 1) module-default pad, auto block size (single grid step)
    pad = int(H / 21)
    shift = jax.random.randint(ks, (N, 2), 0, 2 * pad + 1, dtype=jnp.int32)
    out = jax.block_until_ready(random_shifts_crop(x, shift, pad))
    assert out.shape == (N, C, H, W)
    assert np.all(np.isfinite(np.asarray(out)))
    assert np.array_equal(np.asarray(out), ref_crop(x, shift, pad)), "pad=1 mismatch"

    # 2) forced small block size -> cdiv grid with a masked tail (5 = 2 + 2 + 1)
    out_tail = jax.block_until_ready(random_shifts_crop(x, shift, pad, block_size=2))
    assert np.array_equal(np.asarray(out_tail), ref_crop(x, shift, pad)), "tail mismatch"

    # 3) larger pad exercises the multi-row edge handling and the wider shift ladder
    pad2 = 2
    shift2 = jax.random.randint(jax.random.fold_in(ks, 1), (N, 2), 0, 2 * pad2 + 1,
                                dtype=jnp.int32)
    out2 = jax.block_until_ready(random_shifts_crop(x, shift2, pad2))
    assert np.array_equal(np.asarray(out2), ref_crop(x, shift2, pad2)), "pad=2 mismatch"

    # 4) end-to-end module-equivalent call (same key -> same shifts as test 1)
    out3 = jax.block_until_ready(random_shifts_aug(x, ks, img_size=H))
    assert np.array_equal(np.asarray(out3), ref_crop(x, shift, pad)), "aug mismatch"

    print("KERNEL_OK")
</pallas_src>

<mosaic_0001>
module attributes {stable_mosaic.version = 11 : i64} {
  func.func @_shift_crop_kernel(%arg0: i32, %arg1: memref<10xi32, #tpu.memory_space<smem>>, %arg2: memref<5x4x32x32xf32, #tpu.memory_space<vmem>>, %arg3: memref<5x4x32x32xf32, #tpu.memory_space<vmem>>) attributes {dimension_semantics = [#tpu.dimension_semantics<parallel>], iteration_bounds = array<i64: 1>, scalar_prefetch = 1 : i64, scratch_operands = 0 : i64, tpu.core_type = #tpu.core_type<tc>, window_params = [{transform_indices = @transform_0, window_bounds = array<i64: 5, 4, 32, 32>}, {transform_indices = @transform_1, window_bounds = array<i64: 5, 4, 32, 32>}]} {
    %c0_i32 = arith.constant 0 : i32
    %c5_i32 = arith.constant 5 : i32
    %0 = arith.addi %c0_i32, %c5_i32 : i32
    %c1_i32 = arith.constant 1 : i32
    scf.for %arg4 = %c0_i32 to %0 step %c1_i32  : i32 {
      %c1_i32_1 = arith.constant 1 : i32
      %1 = arith.muli %arg4, %c1_i32_1 : i32
      %c0_i32_2 = arith.constant 0 : i32
      %2 = arith.addi %c0_i32_2, %1 : i32
      %c5_i32_3 = arith.constant 5 : i32
      %3 = arith.muli %arg0, %c5_i32_3 : i32
      %4 = arith.addi %3, %2 : i32
      %c5_i32_4 = arith.constant 5 : i32
      %5 = arith.cmpi slt, %4, %c5_i32_4 : i32
      %6 = arith.extui %5 : i1 to i32
      %c0_i32_5 = arith.constant 0 : i32
      %7 = arith.cmpi ne, %6, %c0_i32_5 : i32
      scf.if %7 {
        %c2_i32 = arith.constant 2 : i32
        %8 = arith.muli %c2_i32, %4 : i32
        %9 = arith.index_cast %8 : i32 to index
        %10 = memref.load %arg1[%9] : memref<10xi32, #tpu.memory_space<smem>>
        %c0_i32_6 = arith.constant 0 : i32
        %c2_i32_7 = arith.constant 2 : i32
        %11 = arith.maxsi %c0_i32_6, %10 : i32
        %12 = arith.minsi %c2_i32_7, %11 : i32
        %c2_i32_8 = arith.constant 2 : i32
        %13 = arith.muli %c2_i32_8, %4 : i32
        %c1_i32_9 = arith.constant 1 : i32
        %14 = arith.addi %13, %c1_i32_9 : i32
        %15 = arith.index_cast %14 : i32 to index
        %16 = memref.load %arg1[%15] : memref<10xi32, #tpu.memory_space<smem>>
        %c0_i32_10 = arith.constant 0 : i32
        %c2_i32_11 = arith.constant 2 : i32
        %17 = arith.maxsi %c0_i32_10, %16 : i32
        %18 = arith.minsi %c2_i32_11, %17 : i32
        %c0_i32_12 = arith.constant 0 : i32
        %19 = arith.cmpi sle, %12, %c0_i32_12 : i32
        %20 = arith.extui %19 : i1 to i32
        %c0_i32_13 = arith.constant 0 : i32
        %21 = arith.cmpi ne, %20, %c0_i32_13 : i32
        scf.if %21 {
          %c1_i32_18 = arith.constant 1 : i32
          %28 = arith.subi %18, %c1_i32_18 : i32
          %c0_i32_19 = arith.constant 0 : i32
          %29 = arith.addi %28, %c0_i32_19 : i32
          %c0_i32_20 = arith.constant 0 : i32
          %30 = arith.maxsi %29, %c0_i32_20 : i32
          %31 = arith.index_cast %2 : i32 to index
          %c0 = arith.constant 0 : index
          %32 = arith.index_cast %30 : i32 to index
          %c0_21 = arith.constant 0 : index
          %33 = vector.load %arg2[%31, %c0, %32, %c0_21] : memref<5x4x32x32xf32, #tpu.memory_space<vmem>>, vector<1x4x1x31xf32>
          %34 = vector.shape_cast %33 : vector<1x4x1x31xf32> to vector<4x1x31xf32>
          %35 = arith.index_cast %2 : i32 to index
          %c0_22 = arith.constant 0 : index
          %c0_23 = arith.constant 0 : index
          %c1 = arith.constant 1 : index
          %36 = vector.load %arg3[%35, %c0_22, %c0_23, %c1] : memref<5x4x32x32xf32, #tpu.memory_space<vmem>>, vector<1x4x1x31xf32>
          %37 = vector.shape_cast %36 : vector<1x4x1x31xf32> to vector<4x1x31xf32>
          %38 = vector.shape_cast %34 : vector<4x1x31xf32> to vector<1x4x1x31xf32>
          tpu.vector_store %arg3[%35, %c0_22, %c0_23, %c1], %38 {strides = array<i32>} : memref<5x4x32x32xf32, #tpu.memory_space<vmem>>, vector<1x4x1x31xf32>,
          %39 = arith.index_cast %2 : i32 to index
          %c0_24 = arith.constant 0 : index
          %40 = arith.index_cast %30 : i32 to index
          %c0_25 = arith.constant 0 : index
          %41 = vector.load %arg2[%39, %c0_24, %40, %c0_25] : memref<5x4x32x32xf32, #tpu.memory_space<vmem>>, vector<1x4x1x1xf32>
          %42 = vector.shape_cast %41 : vector<1x4x1x1xf32> to vector<4x1x1xf32>
          %43 = arith.index_cast %2 : i32 to index
          %c0_26 = arith.constant 0 : index
          %c0_27 = arith.constant 0 : index
          %c0_28 = arith.constant 0 : index
          %44 = vector.load %arg3[%43, %c0_26, %c0_27, %c0_28] : memref<5x4x32x32xf32, #tpu.memory_space<vmem>>, vector<1x4x1x1xf32>
          %45 = vector.shape_cast %44 : vector<1x4x1x1xf32> to vector<4x1x1xf32>
          %46 = vector.shape_cast %42 : vector<4x1x1xf32> to vector<1x4x1x1xf32>
          tpu.vector_store %arg3[%43, %c0_26, %c0_27, %c0_28], %46 {strides = array<i32>} : memref<5x4x32x32xf32, #tpu.memory_space<vmem>>, vector<1x4x1x1xf32>,
          %47 = arith.index_cast %2 : i32 to index
          %c0_29 = arith.constant 0 : index
          %48 = arith.index_cast %18 : i32 to index
          %c0_30 = arith.constant 0 : index
          %49 = vector.load %arg2[%47, %c0_29, %48, %c0_30] : memref<5x4x32x32xf32, #tpu.memory_space<vmem>>, vector<1x4x30x31xf32>
          %50 = vector.shape_cast %49 : vector<1x4x30x31xf32> to vector<4x30x31xf32>
          %51 = arith.index_cast %2 : i32 to index
          %c0_31 = arith.constant 0 : index
          %c1_32 = arith.constant 1 : index
          %c1_33 = arith.constant 1 : index
          %52 = vector.load %arg3[%51, %c0_31, %c1_32, %c1_33] : memref<5x4x32x32xf32, #tpu.memory_space<vmem>>, vector<1x4x30x31xf32>
          %53 = vector.shape_cast %52 : vector<1x4x30x31xf32> to vector<4x30x31xf32>
          %54 = vector.shape_cast %50 : vector<4x30x31xf32> to vector<1x4x30x31xf32>
          tpu.vector_store %arg3[%51, %c0_31, %c1_32, %c1_33], %54 {strides = array<i32>} : memref<5x4x32x32xf32, #tpu.memory_space<vmem>>, vector<1x4x30x31xf32>,
          %55 = arith.index_cast %2 : i32 to index
          %c0_34 = arith.constant 0 : index
          %56 = arith.index_cast %18 : i32 to index
          %c0_35 = arith.constant 0 : index
          %57 = vector.load %arg2[%55, %c0_34, %56, %c0_35] : memref<5x4x32x32xf32, #tpu.memory_space<vmem>>, vector<1x4x30x1xf32>
          %58 = vector.shape_cast %57 : vector<1x4x30x1xf32> to vector<4x30x1xf32>
          %59 = arith.index_cast %2 : i32 to index
          %c0_36 = arith.constant 0 : index
          %c1_37 = arith.constant 1 : index
          %c0_38 = arith.constant 0 : index
          %60 = vector.load %arg3[%59, %c0_36, %c1_37, %c0_38] : memref<5x4x32x32xf32, #tpu.memory_space<vmem>>, vector<1x4x30x1xf32>
          %61 = vector.shape_cast %60 : vector<1x4x30x1xf32> to vector<4x30x1xf32>
          %62 = vector.shape_cast %58 : vector<4x30x1xf32> to vector<1x4x30x1xf32>
          tpu.vector_store %arg3[%59, %c0_36, %c1_37, %c0_38], %62 {strides = array<i32>} : memref<5x4x32x32xf32, #tpu.memory_space<vmem>>, vector<1x4x30x1xf32>,
          %c30_i32 = arith.constant 30 : i32
          %63 = arith.addi %18, %c30_i32 : i32
          %c0_i32_39 = arith.constant 0 : i32
          %64 = arith.addi %63, %c0_i32_39 : i32
          %c31_i32 = arith.constant 31 : i32
          %65 = arith.minsi %64, %c31_i32 : i32
          %66 = arith.index_cast %2 : i32 to index
          %c0_40 = arith.constant 0 : index
          %67 = arith.index_cast %65 : i32 to index
          %c0_41 = arith.constant 0 : index
          %68 = vector.load %arg2[%66, %c0_40, %67, %c0_41] : memref<5x4x32x32xf32, #tpu.memory_space<vmem>>, vector<1x4x1x31xf32>
          %69 = vector.shape_cast %68 : vector<1x4x1x31xf32> to vector<4x1x31xf32>
          %70 = arith.index_cast %2 : i32 to index
          %c0_42 = arith.constant 0 : index
          %c31 = arith.constant 31 : index
          %c1_43 = arith.constant 1 : index
          %71 = vector.load %arg3[%70, %c0_42, %c31, %c1_43] : memref<5x4x32x32xf32, #tpu.memory_space<vmem>>, vector<1x4x1x31xf32>
          %72 = vector.shape_cast %71 : vector<1x4x1x31xf32> to vector<4x1x31xf32>
          %73 = vector.shape_cast %69 : vector<4x1x31xf32> to vector<1x4x1x31xf32>
          tpu.vector_store %arg3[%70, %c0_42, %c31, %c1_43], %73 {strides = array<i32>} : memref<5x4x32x32xf32, #tpu.memory_space<vmem>>, vector<1x4x1x31xf32>,
          %74 = arith.index_cast %2 : i32 to index
          %c0_44 = arith.constant 0 : index
          %75 = arith.index_cast %65 : i32 to index
          %c0_45 = arith.constant 0 : index
          %76 = vector.load %arg2[%74, %c0_44, %75, %c0_45] : memref<5x4x32x32xf32, #tpu.memory_space<vmem>>, vector<1x4x1x1xf32>
          %77 = vector.shape_cast %76 : vector<1x4x1x1xf32> to vector<4x1x1xf32>
          %78 = arith.index_cast %2 : i32 to index
          %c0_46 = arith.constant 0 : index
          %c31_47 = arith.constant 31 : index
          %c0_48 = arith.constant 0 : index
          %79 = vector.load %arg3[%78, %c0_46, %c31_47, %c0_48] : memref<5x4x32x32xf32, #tpu.memory_space<vmem>>, vector<1x4x1x1xf32>
          %80 = vector.shape_cast %79 : vector<1x4x1x1xf32> to vector<4x1x1xf32>
          %81 = vector.shape_cast %77 : vector<4x1x1xf32> to vector<1x4x1x1xf32>
          tpu.vector_store %arg3[%78, %c0_46, %c31_47, %c0_48], %81 {strides = array<i32>} : memref<5x4x32x32xf32, #tpu.memory_space<vmem>>, vector<1x4x1x1xf32>,
        } else {
        }
        %c1_i32_14 = arith.constant 1 : i32
        %22 = arith.cmpi eq, %12, %c1_i32_14 : i32
        %23 = arith.extui %22 : i1 to i32
        %c0_i32_15 = arith.constant 0 : i32
        %24 = arith.cmpi ne, %23, %c0_i32_15 : i32
        scf.if %24 {
          %c1_i32_18 = arith.constant 1 : i32
          %28 = arith.subi %18, %c1_i32_18 : i32
          %c0_i32_19 = arith.constant 0 : i32
          %29 = arith.addi %28, %c0_i32_19 : i32
          %c0_i32_20 = arith.constant 0 : i32
          %30 = arith.maxsi %29, %c0_i32_20 : i32
          %31 = arith.index_cast %2 : i32 to index
          %c0 = arith.constant 0 : index
          %32 = arith.index_cast %30 : i32 to index
          %c0_21 = arith.constant 0 : index
          %33 = vector.load %arg2[%31, %c0, %32, %c0_21] : memref<5x4x32x32xf32, #tpu.memory_space<vmem>>, vector<1x4x1x32xf32>
          %34 = vector.shape_cast %33 : vector<1x4x1x32xf32> to vector<4x1x32xf32>
          %35 = arith.index_cast %2 : i32 to index
          %c0_22 = arith.constant 0 : index
          %c0_23 = arith.constant 0 : index
          %c0_24 = arith.constant 0 : index
          %36 = vector.load %arg3[%35, %c0_22, %c0_23, %c0_24] : memref<5x4x32x32xf32, #tpu.memory_space<vmem>>, vector<1x4x1x32xf32>
          %37 = vector.shape_cast %36 : vector<1x4x1x32xf32> to vector<4x1x32xf32>
          %38 = vector.shape_cast %34 : vector<4x1x32xf32> to vector<1x4x1x32xf32>
          tpu.vector_store %arg3[%35, %c0_22, %c0_23, %c0_24], %38 {strides = array<i32>} : memref<5x4x32x32xf32, #tpu.memory_space<vmem>>, vector<1x4x1x32xf32>,
          %39 = arith.index_cast %2 : i32 to index
          %c0_25 = arith.constant 0 : index
          %40 = arith.index_cast %18 : i32 to index
          %c0_26 = arith.constant 0 : index
          %41 = vector.load %arg2[%39, %c0_25, %40, %c0_26] : memref<5x4x32x32xf32, #tpu.memory_space<vmem>>, vector<1x4x30x32xf32>
          %42 = vector.shape_cast %41 : vector<1x4x30x32xf32> to vector<4x30x32xf32>
          %43 = arith.index_cast %2 : i32 to index
          %c0_27 = arith.constant 0 : index
          %c1 = arith.constant 1 : index
          %c0_28 = arith.constant 0 : index
          %44 = vector.load %arg3[%43, %c0_27, %c1, %c0_28] : memref<5x4x32x32xf32, #tpu.memory_space<vmem>>, vector<1x4x30x32xf32>
          %45 = vector.shape_cast %44 : vector<1x4x30x32xf32> to vector<4x30x32xf32>
          %46 = vector.shape_cast %42 : vector<4x30x32xf32> to vector<1x4x30x32xf32>
          tpu.vector_store %arg3[%43, %c0_27, %c1, %c0_28], %46 {strides = array<i32>} : memref<5x4x32x32xf32, #tpu.memory_space<vmem>>, vector<1x4x30x32xf32>,
          %c30_i32 = arith.constant 30 : i32
          %47 = arith.addi %18, %c30_i32 : i32
          %c0_i32_29 = arith.constant 0 : i32
          %48 = arith.addi %47, %c0_i32_29 : i32
          %c31_i32 = arith.constant 31 : i32
          %49 = arith.minsi %48, %c31_i32 : i32
          %50 = arith.index_cast %2 : i32 to index
          %c0_30 = arith.constant 0 : index
          %51 = arith.index_cast %49 : i32 to index
          %c0_31 = arith.constant 0 : index
          %52 = vector.load %arg2[%50, %c0_30, %51, %c0_31] : memref<5x4x32x32xf32, #tpu.memory_space<vmem>>, vector<1x4x1x32xf32>
          %53 = vector.shape_cast %52 : vector<1x4x1x32xf32> to vector<4x1x32xf32>
          %54 = arith.index_cast %2 : i32 to index
          %c0_32 = arith.constant 0 : index
          %c31 = arith.constant 31 : index
          %c0_33 = arith.constant 0 : index
          %55 = vector.load %arg3[%54, %c0_32, %c31, %c0_33] : memref<5x4x32x32xf32, #tpu.memory_space<vmem>>, vector<1x4x1x32xf32>
          %56 = vector.shape_cast %55 : vector<1x4x1x32xf32> to vector<4x1x32xf32>
          %57 = vector.shape_cast %53 : vector<4x1x32xf32> to vector<1x4x1x32xf32>
          tpu.vector_store %arg3[%54, %c0_32, %c31, %c0_33], %57 {strides = array<i32>} : memref<5x4x32x32xf32, #tpu.memory_space<vmem>>, vector<1x4x1x32xf32>,
        } else {
        }
        %c2_i32_16 = arith.constant 2 : i32
        %25 = arith.cmpi sge, %12, %c2_i32_16 : i32
        %26 = arith.extui %25 : i1 to i32
        %c0_i32_17 = arith.constant 0 : i32
        %27 = arith.cmpi ne, %26, %c0_i32_17 : i32
        scf.if %27 {
          %c1_i32_18 = arith.constant 1 : i32
          %28 = arith.subi %18, %c1_i32_18 : i32
          %c0_i32_19 = arith.constant 0 : i32
          %29 = arith.addi %28, %c0_i32_19 : i32
          %c0_i32_20 = arith.constant 0 : i32
          %30 = arith.maxsi %29, %c0_i32_20 : i32
          %31 = arith.index_cast %2 : i32 to index
          %c0 = arith.constant 0 : index
          %32 = arith.index_cast %30 : i32 to index
          %c1 = arith.constant 1 : index
          %33 = vector.load %arg2[%31, %c0, %32, %c1] : memref<5x4x32x32xf32, #tpu.memory_space<vmem>>, vector<1x4x1x31xf32>
          %34 = vector.shape_cast %33 : vector<1x4x1x31xf32> to vector<4x1x31xf32>
          %35 = arith.index_cast %2 : i32 to index
          %c0_21 = arith.constant 0 : index
          %c0_22 = arith.constant 0 : index
          %c0_23 = arith.constant 0 : index
          %36 = vector.load %arg3[%35, %c0_21, %c0_22, %c0_23] : memref<5x4x32x32xf32, #tpu.memory_space<vmem>>, vector<1x4x1x31xf32>
          %37 = vector.shape_cast %36 : vector<1x4x1x31xf32> to vector<4x1x31xf32>
          %38 = vector.shape_cast %34 : vector<4x1x31xf32> to vector<1x4x1x31xf32>
          tpu.vector_store %arg3[%35, %c0_21, %c0_22, %c0_23], %38 {strides = array<i32>} : memref<5x4x32x32xf32, #tpu.memory_space<vmem>>, vector<1x4x1x31xf32>,
          %39 = arith.index_cast %2 : i32 to index
          %c0_24 = arith.constant 0 : index
          %40 = arith.index_cast %30 : i32 to index
          %c31 = arith.constant 31 : index
          %41 = vector.load %arg2[%39, %c0_24, %40, %c31] : memref<5x4x32x32xf32, #tpu.memory_space<vmem>>, vector<1x4x1x1xf32>
          %42 = vector.shape_cast %41 : vector<1x4x1x1xf32> to vector<4x1x1xf32>
          %43 = arith.index_cast %2 : i32 to index
          %c0_25 = arith.constant 0 : index
          %c0_26 = arith.constant 0 : index
          %c31_27 = arith.constant 31 : index
          %44 = vector.load %arg3[%43, %c0_25, %c0_26, %c31_27] : memref<5x4x32x32xf32, #tpu.memory_space<vmem>>, vector<1x4x1x1xf32>
          %45 = vector.shape_cast %44 : vector<1x4x1x1xf32> to vector<4x1x1xf32>
          %46 = vector.shape_cast %42 : vector<4x1x1xf32> to vector<1x4x1x1xf32>
          tpu.vector_store %arg3[%43, %c0_25, %c0_26, %c31_27], %46 {strides = array<i32>} : memref<5x4x32x32xf32, #tpu.memory_space<vmem>>, vector<1x4x1x1xf32>,
          %47 = arith.index_cast %2 : i32 to index
          %c0_28 = arith.constant 0 : index
          %48 = arith.index_cast %18 : i32 to index
          %c1_29 = arith.constant 1 : index
          %49 = vector.load %arg2[%47, %c0_28, %48, %c1_29] : memref<5x4x32x32xf32, #tpu.memory_space<vmem>>, vector<1x4x30x31xf32>
          %50 = vector.shape_cast %49 : vector<1x4x30x31xf32> to vector<4x30x31xf32>
          %51 = arith.index_cast %2 : i32 to index
          %c0_30 = arith.constant 0 : index
          %c1_31 = arith.constant 1 : index
          %c0_32 = arith.constant 0 : index
          %52 = vector.load %arg3[%51, %c0_30, %c1_31, %c0_32] : memref<5x4x32x32xf32, #tpu.memory_space<vmem>>, vector<1x4x30x31xf32>
          %53 = vector.shape_cast %52 : vector<1x4x30x31xf32> to vector<4x30x31xf32>
          %54 = vector.shape_cast %50 : vector<4x30x31xf32> to vector<1x4x30x31xf32>
          tpu.vector_store %arg3[%51, %c0_30, %c1_31, %c0_32], %54 {strides = array<i32>} : memref<5x4x32x32xf32, #tpu.memory_space<vmem>>, vector<1x4x30x31xf32>,
          %55 = arith.index_cast %2 : i32 to index
          %c0_33 = arith.constant 0 : index
          %56 = arith.index_cast %18 : i32 to index
          %c31_34 = arith.constant 31 : index
          %57 = vector.load %arg2[%55, %c0_33, %56, %c31_34] : memref<5x4x32x32xf32, #tpu.memory_space<vmem>>, vector<1x4x30x1xf32>
          %58 = vector.shape_cast %57 : vector<1x4x30x1xf32> to vector<4x30x1xf32>
          %59 = arith.index_cast %2 : i32 to index
          %c0_35 = arith.constant 0 : index
          %c1_36 = arith.constant 1 : index
          %c31_37 = arith.constant 31 : index
          %60 = vector.load %arg3[%59, %c0_35, %c1_36, %c31_37] : memref<5x4x32x32xf32, #tpu.memory_space<vmem>>, vector<1x4x30x1xf32>
          %61 = vector.shape_cast %60 : vector<1x4x30x1xf32> to vector<4x30x1xf32>
          %62 = vector.shape_cast %58 : vector<4x30x1xf32> to vector<1x4x30x1xf32>
          tpu.vector_store %arg3[%59, %c0_35, %c1_36, %c31_37], %62 {strides = array<i32>} : memref<5x4x32x32xf32, #tpu.memory_space<vmem>>, vector<1x4x30x1xf32>,
          %c30_i32 = arith.constant 30 : i32
          %63 = arith.addi %18, %c30_i32 : i32
          %c0_i32_38 = arith.constant 0 : i32
          %64 = arith.addi %63, %c0_i32_38 : i32
          %c31_i32 = arith.constant 31 : i32
          %65 = arith.minsi %64, %c31_i32 : i32
          %66 = arith.index_cast %2 : i32 to index
          %c0_39 = arith.constant 0 : index
          %67 = arith.index_cast %65 : i32 to index
          %c1_40 = arith.constant 1 : index
          %68 = vector.load %arg2[%66, %c0_39, %67, %c1_40] : memref<5x4x32x32xf32, #tpu.memory_space<vmem>>, vector<1x4x1x31xf32>
          %69 = vector.shape_cast %68 : vector<1x4x1x31xf32> to vector<4x1x31xf32>
          %70 = arith.index_cast %2 : i32 to index
          %c0_41 = arith.constant 0 : index
          %c31_42 = arith.constant 31 : index
          %c0_43 = arith.constant 0 : index
          %71 = vector.load %arg3[%70, %c0_41, %c31_42, %c0_43] : memref<5x4x32x32xf32, #tpu.memory_space<vmem>>, vector<1x4x1x31xf32>
          %72 = vector.shape_cast %71 : vector<1x4x1x31xf32> to vector<4x1x31xf32>
          %73 = vector.shape_cast %69 : vector<4x1x31xf32> to vector<1x4x1x31xf32>
          tpu.vector_store %arg3[%70, %c0_41, %c31_42, %c0_43], %73 {strides = array<i32>} : memref<5x4x32x32xf32, #tpu.memory_space<vmem>>, vector<1x4x1x31xf32>,
          %74 = arith.index_cast %2 : i32 to index
          %c0_44 = arith.constant 0 : index
          %75 = arith.index_cast %65 : i32 to index
          %c31_45 = arith.constant 31 : index
          %76 = vector.load %arg2[%74, %c0_44, %75, %c31_45] : memref<5x4x32x32xf32, #tpu.memory_space<vmem>>, vector<1x4x1x1xf32>
          %77 = vector.shape_cast %76 : vector<1x4x1x1xf32> to vector<4x1x1xf32>
          %78 = arith.index_cast %2 : i32 to index
          %c0_46 = arith.constant 0 : index
          %c31_47 = arith.constant 31 : index
          %c31_48 = arith.constant 31 : index
          %79 = vector.load %arg3[%78, %c0_46, %c31_47, %c31_48] : memref<5x4x32x32xf32, #tpu.memory_space<vmem>>, vector<1x4x1x1xf32>
          %80 = vector.shape_cast %79 : vector<1x4x1x1xf32> to vector<4x1x1xf32>
          %81 = vector.shape_cast %77 : vector<4x1x1xf32> to vector<1x4x1x1xf32>
          tpu.vector_store %arg3[%78, %c0_46, %c31_47, %c31_48], %81 {strides = array<i32>} : memref<5x4x32x32xf32, #tpu.memory_space<vmem>>, vector<1x4x1x1xf32>,
        } else {
        }
      } else {
      }
    }
    %c5_i32_0 = arith.constant 5 : i32
    return
  }
  func.func @transform_0(%arg0: i32, %arg1: memref<10xi32, #tpu.memory_space<smem>>) -> (i32, i32, i32, i32) {
    %c0_i32 = arith.constant 0 : i32
    %c0_i32_0 = arith.constant 0 : i32
    %c0_i32_1 = arith.constant 0 : i32
    %c0_i32_2 = arith.constant 0 : i32
    return %arg0, %c0_i32, %c0_i32_0, %c0_i32_1 : i32, i32, i32, i32
  }
  func.func @transform_1(%arg0: i32, %arg1: memref<10xi32, #tpu.memory_space<smem>>) -> (i32, i32, i32, i32) {
    %c0_i32 = arith.constant 0 : i32
    %c0_i32_0 = arith.constant 0 : i32
    %c0_i32_1 = arith.constant 0 : i32
    %c0_i32_2 = arith.constant 0 : i32
    return %arg0, %c0_i32, %c0_i32_0, %c0_i32_1 : i32, i32, i32, i32
  }
}

</mosaic_0001>

<bundles_post_ra>
// kernel: tpu_custom_call.1
= control target key start
LH: loop header
LB: loop body
LE: loop exit
PB: predicated region body
PF: predicated region fallthrough
CT: control target
= control target key end

     0   :  { %s1329_s0 = inlined_call_operand.hbm [shape: s32[10], index: 0, kind: input, shape index: {}]   ;;  %s1330_s1 = inlined_call_operand.hbm [shape: f32[5,4,32,32], index: 1, kind: input, shape index: {}]   ;;  %s1331_s2 = inlined_call_operand.hbm [shape: f32[5,4,32,32], index: 2, kind: output, shape index: {}]  }
   0x1   :  { %s648_s11 = scalar_lea.hbm %s1329_s0, 16 }
   0x2   :  { %p649_p0 = scmp.ne.s32.totalorder %s1329_s0, %s648_s11  ;;  %p652_p1 = scmp.lt.u32.totalorder %s648_s11, %s1329_s0 }
   0x4   :  { %p654_p2 = pnand %p652_p1, %p649_p0 }
   0x6   :  { %657 = shalt.err (!%p654_p2)  }
   0x7   :  { %s716_s16 = smov [#allocation3]  }
   0x8   :  { %8 = dma.hbm_to_smem %s1329_s0, 16, %s716_s16, [#allocation2] }
   0x9   :  { %706 = dma.done.wait [#allocation2], 16 }
   0xa   :  { %707 = vsyncadd [#allocation2], 4294967280 }
   0xb   :  { %10 = sfence }
   0xc   :  { %11 = vsyncpa [#allocation5], 0 }
   0xd   :  { %12 = vsyncpa [#allocation6], 0  ;;  %s717_s19 = smov [#allocation4]   ;;  %s658_s23 = scalar_lea.hbm %s1330_s1, 10240 }
   0xe   :  { %s18_s20 = sshll.u32 %s717_s19, 4  ;;  %p659_p3 = scmp.ne.s32.totalorder %s1330_s1, %s658_s23  ;;  %s19_s20 = int_to_ptr.vmem [resolvable:$true] %s18_s20 }
   0xf   :  { %p662_p4 = scmp.lt.u32.totalorder %s658_s23, %s1330_s1 }
  0x11   :  { %p664_p5 = pnand %p662_p4, %p659_p3 }
  0x13   :  { %667 = shalt.err (!%p664_p5)
}
  0x14   :  { %s668_s0 = scalar_lea.vmem %s19_s20, 10240  ;;  %p673_p7 = scmp.lt.s32.totalorder %s19_s20, %s19_s20 }
  0x15   :  { %p669_p6 = scmp.ne.s32.totalorder %s19_s20, %s668_s0  ;;  %p674_p8 = scmp.lt.s32.totalorder %s668_s0, %s668_s0 }
  0x17   :  { %p675_p9 = por %p674_p8, %p673_p7 }
  0x19   :  { %p676_p10 = pnand %p675_p9, %p669_p6 }
  0x1b   :  { %679 = shalt.err (!%p676_p10)
}
  0x1c   :  { %s718_s28 = smov 128   ;;  %s719_s29 = smov 8  }
  0x1d   :  { %24 = dma.hbm_to_vmem [thread:$0]  %s1330_s1, 10240, %s19_s20, [#allocation5], %s718_s28, %s718_s28, %s719_s29  }
  0x1e   :  { %708 = dma.done.wait [#allocation5], 10240  }
  0x1f   :  { %709 = vsyncadd [#allocation5], 4294957056  ;;  %s765_s4 = smov 0  }
  0x20 LB: > { %p608_p11 = scmp.ge.s32.totalorder %s714_s4, 5  ;;  %s714_s4 = sphi %s765_s4, %s33_s4  }
  0x21   : > { %s609_s5 = sshll.u32 (!%p608_p11), %s714_s4, 1 }
  0x22   : > { %39 = sbr.rel (%p608_p11) target bundleno = 408 (0x198), region = 20  ;;  %s41_s6 = sld [smem:[#allocation3 + %s609_s5]] (!%p608_p11) }
  0x23   : > { %s46_s7 = sadd.s32 (!%p608_p11), 1, %s609_s5 }
  0x24   : > { %s47_s8 = sld [smem:[#allocation3 + %s46_s7]] (!%p608_p11) }
  0x28   : > { %p42_p12 = scmp.gt.s32.totalorder (!%p608_p11), %s41_s6, 0  ;;  %p610_p13 = scmp.lt.s32.totalorder (!%p608_p11), %s41_s6, 2 }
  0x2a   : > { %p48_p0 = scmp.gt.s32.totalorder %s47_s8, 0  ;;  %p615_p1 = scmp.lt.s32.totalorder %s47_s8, 2 }
  0x2b   : > { %s1334_s6 = smov (!%p42_p12, %s41_s6), 0 }
  0x2c   : > { %s1336_s8 = smov (!%p48_p0, %s47_s8), 0  ;;  %s1338_s6 = smov (!%p610_p13, %s1334_s6), 2 }
  0x2d   : > { %s1340_s8 = smov (!%p615_p1, %s1336_s8), 2  ;;  %p620_p2 = scmp.gt.s32.totalorder %s1338_s6, 0 }
  0x2e   : > { %s778_s1 = sshll.u32 (!%p620_p2), %s714_s4, 7  ;;  %s621_s10 = sadd.s32 (!%p620_p2), 4294967295, %s1340_s8  ;;  %vm179_vm0 = vcmask (!%p620_p2), 261128   ;;  %vm213_vm1 = vcmask (!%p620_p2), 7168   ;;  %vm83_vm2 = vcmask (!%p620_p2), 253960   ;;  %vm92_vm3 = vcmask (!%p620_p2), 0  }
  0x2f   : > { %55 = sbr.rel (%p620_p2) target bundleno = 216 (0xd8), region = 24  ;;  %s97_s9 = sadd.s32 (!%p620_p2), %s1340_s8, %s778_s1  ;;  %vm183_vm4 = vcmask (!%p620_p2), 259080   ;;  %vm217_vm5 = vcmask (!%p620_p2), 5120  }
  0x30   : > { %s783_s11 = scalar_lea.vmem (!%p620_p2), [#allocation4], %s97_s9  ;;  %p57_p3 = scmp.gt.s32.totalorder (!%p620_p2), %s621_s10, 0 }
  0x31   : > { %v786_v0 = vld [vmem:[%s783_s11 + $0x8] sm:$0xff] (!%p620_p2)  ;;  %v789_v1 = vld [vmem:[%s783_s11] sm:$0xff] (!%p620_p2)  ;;  %s720_s12 = smov (!%p620_p2), 1   ;;  %v102_v6 = vld [vmem:[%s783_s11 + $0x18] sm:$0x3f] (!%p620_p2)  ;;  %s231_s15 = sadd.s32 (!%p620_p2), 30, %s1340_s8 }
  0x32   : > { %133 = vrot.lane.b32.xlu1 (!%p620_p2), %v786_v0, %s720_s12  ;;  %131 = vrot.lane.b32.xlu0 (!%p620_p2), %v789_v1, %s720_s12  ;;  %v808_v7 = vld [vmem:[%s783_s11 + $0x10] sm:$0xff] (!%p620_p2)  ;;  %v814_v8 = vld [vmem:[%s783_s11 + $0x28] sm:$0xff] (!%p620_p2)  ;;  %p232_p4 = scmp.lt.s32.totalorder (!%p620_p2), %s231_s15, 31  ;;  %s877_s18 = scalar_lea.vmem (!%p620_p2), [#allocation7], %s778_s1 }
  0x33   : > { %v817_v9 = vld [vmem:[%s783_s11 + $0x20] sm:$0xff] (!%p620_p2)  ;;  %v106_v10 = vld [vmem:[%s783_s11 + $0x38] sm:$0x3f] (!%p620_p2)  ;;  %v825_v11 = vld [vmem:[%s783_s11 + $0x30] sm:$0xff] (!%p620_p2) }
  0x34   : > { %v832_v12 = vld [vmem:[%s783_s11 + $0x48] sm:$0xff] (!%p620_p2)  ;;  %v835_v13 = vld [vmem:[%s783_s11 + $0x40] sm:$0xff] (!%p620_p2)  ;;  %v110_v14 = vld [vmem:[%s783_s11 + $0x58] sm:$0x3f] (!%p620_p2) }
  0x35   : > { %v843_v15 = vld [vmem:[%s783_s11 + $0x50] sm:$0xff] (!%p620_p2)  ;;  %v849_v16 = vld [vmem:[%s783_s11 + $0x68] sm:$0xff] (!%p620_p2)  ;;  %v852_v17 = vld [vmem:[%s783_s11 + $0x60] sm:$0xff] (!%p620_p2) }
  0x36   : > { %s1342_s10 = smov (!%p57_p3, %s621_s10), 0  ;;  %s1344_s15 = smov (!%p232_p4, %s231_s15), 31  ;;  %v114_v18 = vld [vmem:[%s783_s11 + $0x78] sm:$0x3f]  ;;  %v861_v19 = vld [vmem:[%s783_s11 + $0x70] sm:$0xff] }
  0x37   : > { %s60_s13 = sadd.s32 %s778_s1, %s1342_s10  ;;  %s234_s16 = sadd.s32 %s778_s1, %s1344_s15  ;;  %v200_v34 = vld [vmem:[%s783_s11 + $0x18] sm:$0x3f] }
  0x38   : > { %s796_s14 = scalar_lea.vmem [#allocation4], %s60_s13  ;;  %s866_s17 = scalar_lea.vmem [#allocation4], %s234_s16  ;;  %v204_v39 = vld [vmem:[%s783_s11 + $0x38] sm:$0x3f] }
  0x39   : > { %v64_v2 = vld [vmem:[%s796_s14 + $0x40] sm:$0x1]  ;;  %v208_v44 = vld [vmem:[%s783_s11 + $0x58] sm:$0x3f] }
  0x3a   : > { %v62_v3 = vld [vmem:[%s796_s14] sm:$0x1]  ;;  %74 = vrot.lane.b32.xlu1 %v64_v2, %s720_s12  ;;  %v212_v49 = vld [vmem:[%s783_s11 + $0x78] sm:$0x3f] }
  0x3b   : > { %70 = vrot.lane.b32.xlu0 %v62_v3, %s720_s12  ;;  %v65_v4 = vld [vmem:[%s796_s14 + $0x60] sm:$0x1] }
  0x3c   : > { %v63_v5 = vld [vmem:[%s796_s14 + $0x20] sm:$0x1] }
  0x3d   : > { %v237_v20 = vld [vmem:[%s866_s17 + $0x20] sm:$0x1] }
  0x3e   : > { %76 = vrot.lane.b32.xlu1 %v65_v4, %s720_s12  ;;  %v236_v21 = vld [vmem:[%s866_s17] sm:$0x1] }
  0x3f   : > { %72 = vrot.lane.b32.xlu0 %v63_v5, %s720_s12  ;;  %v239_v22 = vld [vmem:[%s866_s17 + $0x60] sm:$0x1] }
  0x40   : > { %v238_v23 = vld [vmem:[%s866_s17 + $0x40] sm:$0x1] }
  0x41   : > { %v90_v26 = vld [vmem:[%s796_s14 + $0x40] sm:$0x1] }
  0x42   : > { %137 = vrot.lane.b32.xlu1 %v102_v6, %s720_s12  ;;  %v88_v27 = vld [vmem:[%s796_s14] sm:$0x1] }
  0x43   : > { %135 = vrot.lane.b32.xlu0 %v808_v7, %s720_s12  ;;  %v91_v30 = vld [vmem:[%s796_s14 + $0x60] sm:$0x1] }
  0x44   : > { %v89_v31 = vld [vmem:[%s796_s14 + $0x20] sm:$0x1] }
  0x45   : > { %v261_v52 = vld [vmem:[%s866_s17 + $0x20] sm:$0x1] }
  0x46   : > { %141 = vrot.lane.b32.xlu1 %v814_v8, %s720_s12  ;;  %v260_v53 = vld [vmem:[%s866_s17] sm:$0x1] }
  0x47   : > { %139 = vrot.lane.b32.xlu0 %v817_v9, %s720_s12  ;;  %v263_v56 = vld [vmem:[%s866_s17 + $0x60] sm:$0x1] }
  0x48   : > { %v262_v57 = vld [vmem:[%s866_s17 + $0x40] sm:$0x1] }
  0x4a   : > { %145 = vrot.lane.b32.xlu1 %v106_v10, %s720_s12 }
  0x4b   : > { %143 = vrot.lane.b32.xlu0 %v825_v11, %s720_s12 }
  0x4e   : > { %149 = vrot.lane.b32.xlu1 %v832_v12, %s720_s12 }
  0x4f   : > { %147 = vrot.lane.b32.xlu0 %v835_v13, %s720_s12 }
  0x52   : > { %153 = vrot.lane.b32.xlu1 %v110_v14, %s720_s12 }
  0x53   : > { %151 = vrot.lane.b32.xlu0 %v843_v15, %s720_s12 }
  0x56   : > { %157 = vrot.lane.b32.xlu1 %v849_v16, %s720_s12 }
  0x57   : > { %155 = vrot.lane.b32.xlu0 %v852_v17, %s720_s12 }
  0x5a   : > { %161 = vrot.lane.b32.xlu1 %v114_v18, %s720_s12 }
  0x5b   : > { %159 = vrot.lane.b32.xlu0 %v861_v19, %s720_s12 }
  0x5e   : > { %246 = vrot.lane.b32.xlu1 %v237_v20, %s720_s12 }
  0x5f   : > { %244 = vrot.lane.b32.xlu0 %v236_v21, %s720_s12 }
  0x62   : > { %250 = vrot.lane.b32.xlu1 %v239_v22, %s720_s12 }
  0x63   : > { %248 = vrot.lane.b32.xlu0 %v238_v23, %s720_s12 }
  0xa4   : > { %v134_v24 = vpop.permute.xlu1 %133  ;;  %v132_v25 = vpop.permute.xlu0 %131 }
  0xa5   : > { %181 = vst.msk [vmem:[%s877_s18 + $0x9] sm:$0xff] %vm179_vm0, %v134_v24  ;;  %180 = vst.msk [vmem:[%s877_s18 + $0x1] sm:$0xff] %vm179_vm0, %v132_v25 }
  0xa6   : > { %215 = vst.msk [vmem:[%s877_s18 + $0x9] sm:$0xff] %vm213_vm1, %v786_v0  ;;  %214 = vst.msk [vmem:[%s877_s18 + $0x1] sm:$0xff] %vm213_vm1, %v789_v1 }
  0xac   : > { %v75_v28 = vpop.permute.xlu1 %74 }
  0xad   : > { %v71_v29 = vpop.permute.xlu0 %70  ;;  %86 = vst.msk [vmem:[%s877_s18 + $0x40] sm:$0x1] %vm83_vm2, %v75_v28 }
  0xae   : > { %84 = vst.msk [vmem:[%s877_s18] sm:$0x1] %vm83_vm2, %v71_v29 }
  0xaf   : > { %95 = vst.msk [vmem:[%s877_s18 + $0x40] sm:$0x1] %vm92_vm3, %v90_v26  ;;  %93 = vst.msk [vmem:[%s877_s18] sm:$0x1] %vm92_vm3, %v88_v27 }
  0xb0   : > { %v77_v32 = vpop.permute.xlu1 %76 }
  0xb1   : > { %v73_v33 = vpop.permute.xlu0 %72  ;;  %87 = vst.msk [vmem:[%s877_s18 + $0x60] sm:$0x1] %vm83_vm2, %v77_v32 }
  0xb2   : > { %85 = vst.msk [vmem:[%s877_s18 + $0x20] sm:$0x1] %vm83_vm2, %v73_v33 }
  0xb3   : > { %96 = vst.msk [vmem:[%s877_s18 + $0x60] sm:$0x1] %vm92_vm3, %v91_v30  ;;  %94 = vst.msk [vmem:[%s877_s18 + $0x20] sm:$0x1] %vm92_vm3, %v89_v31 }
  0xb4   : > { %v138_v35 = vpop.permute.xlu1 %137 }
  0xb5   : > { %v136_v36 = vpop.permute.xlu0 %135  ;;  %184 = vst.msk [vmem:[%s877_s18 + $0x19] sm:$0x3f] %vm183_vm4, %v138_v35 }
  0xb6   : > { %182 = vst.msk [vmem:[%s877_s18 + $0x11] sm:$0xff] %vm179_vm0, %v136_v36 }
  0xb7   : > { %218 = vst.msk [vmem:[%s877_s18 + $0x19] sm:$0x3f] %vm217_vm5, %v200_v34 }
  0xb8   : > { %216 = vst.msk [vmem:[%s877_s18 + $0x11] sm:$0xff] %vm213_vm1, %v808_v7  ;;  %v142_v37 = vpop.permute.xlu1 %141 }
  0xb9   : > { %v140_v38 = vpop.permute.xlu0 %139  ;;  %186 = vst.msk [vmem:[%s877_s18 + $0x29] sm:$0xff] %vm179_vm0, %v142_v37 }
  0xba   : > { %185 = vst.msk [vmem:[%s877_s18 + $0x21] sm:$0xff] %vm179_vm0, %v140_v38 }
  0xbb   : > { %220 = vst.msk [vmem:[%s877_s18 + $0x29] sm:$0xff] %vm213_vm1, %v814_v8  ;;  %219 = vst.msk [vmem:[%s877_s18 + $0x21] sm:$0xff] %vm213_vm1, %v817_v9 }
  0xbc   : > { %v146_v40 = vpop.permute.xlu1 %145 }
  0xbd   : > { %v144_v41 = vpop.permute.xlu0 %143  ;;  %188 = vst.msk [vmem:[%s877_s18 + $0x39] sm:$0x3f] %vm183_vm4, %v146_v40 }
  0xbe   : > { %187 = vst.msk [vmem:[%s877_s18 + $0x31] sm:$0xff] %vm179_vm0, %v144_v41 }
  0xbf   : > { %222 = vst.msk [vmem:[%s877_s18 + $0x39] sm:$0x3f] %vm217_vm5, %v204_v39 }
  0xc0   : > { %221 = vst.msk [vmem:[%s877_s18 + $0x31] sm:$0xff] %vm213_vm1, %v825_v11  ;;  %v150_v42 = vpop.permute.xlu1 %149 }
  0xc1   : > { %v148_v43 = vpop.permute.xlu0 %147  ;;  %190 = vst.msk [vmem:[%s877_s18 + $0x49] sm:$0xff] %vm179_vm0, %v150_v42 }
  0xc2   : > { %189 = vst.msk [vmem:[%s877_s18 + $0x41] sm:$0xff] %vm179_vm0, %v148_v43 }
  0xc3   : > { %224 = vst.msk [vmem:[%s877_s18 + $0x49] sm:$0xff] %vm213_vm1, %v832_v12  ;;  %223 = vst.msk [vmem:[%s877_s18 + $0x41] sm:$0xff] %vm213_vm1, %v835_v13 }
  0xc4   : > { %v154_v45 = vpop.permute.xlu1 %153 }
  0xc5   : > { %v152_v46 = vpop.permute.xlu0 %151  ;;  %192 = vst.msk [vmem:[%s877_s18 + $0x59] sm:$0x3f] %vm183_vm4, %v154_v45 }
  0xc6   : > { %191 = vst.msk [vmem:[%s877_s18 + $0x51] sm:$0xff] %vm179_vm0, %v152_v46 }
  0xc7   : > { %226 = vst.msk [vmem:[%s877_s18 + $0x59] sm:$0x3f] %vm217_vm5, %v208_v44 }
  0xc8   : > { %225 = vst.msk [vmem:[%s877_s18 + $0x51] sm:$0xff] %vm213_vm1, %v843_v15  ;;  %v158_v47 = vpop.permute.xlu1 %157 }
  0xc9   : > { %v156_v48 = vpop.permute.xlu0 %155  ;;  %194 = vst.msk [vmem:[%s877_s18 + $0x69] sm:$0xff] %vm179_vm0, %v158_v47 }
  0xca   : > { %193 = vst.msk [vmem:[%s877_s18 + $0x61] sm:$0xff] %vm179_vm0, %v156_v48 }
  0xcb   : > { %228 = vst.msk [vmem:[%s877_s18 + $0x69] sm:$0xff] %vm213_vm1, %v849_v16  ;;  %227 = vst.msk [vmem:[%s877_s18 + $0x61] sm:$0xff] %vm213_vm1, %v852_v17 }
  0xcc   : > { %v162_v50 = vpop.permute.xlu1 %161 }
  0xcd   : > { %v160_v51 = vpop.permute.xlu0 %159  ;;  %196 = vst.msk [vmem:[%s877_s18 + $0x79] sm:$0x3f] %vm183_vm4, %v162_v50 }
  0xce   : > { %195 = vst.msk [vmem:[%s877_s18 + $0x71] sm:$0xff] %vm179_vm0, %v160_v51 }
  0xcf   : > { %230 = vst.msk [vmem:[%s877_s18 + $0x79] sm:$0x3f] %vm217_vm5, %v212_v49 }
  0xd0   : > { %229 = vst.msk [vmem:[%s877_s18 + $0x71] sm:$0xff] %vm213_vm1, %v861_v19  ;;  %v247_v54 = vpop.permute.xlu1 %246 }
  0xd1   : > { %v245_v55 = vpop.permute.xlu0 %244  ;;  %257 = vst.msk [vmem:[%s877_s18 + $0x3f] sm:$0x1] %vm83_vm2, %v247_v54 }
  0xd2   : > { %256 = vst.msk [vmem:[%s877_s18 + $0x1f] sm:$0x1] %vm83_vm2, %v245_v55 }
  0xd3   : > { %265 = vst.msk [vmem:[%s877_s18 + $0x3f] sm:$0x1] %vm92_vm3, %v261_v52  ;;  %264 = vst.msk [vmem:[%s877_s18 + $0x1f] sm:$0x1] %vm92_vm3, %v260_v53 }
  0xd4   : > { %v251_v58 = vpop.permute.xlu1 %250 }
  0xd5   : > { %v249_v59 = vpop.permute.xlu0 %248  ;;  %259 = vst.msk [vmem:[%s877_s18 + $0x7f] sm:$0x1] %vm83_vm2, %v251_v58 }
  0xd6   : > { %258 = vst.msk [vmem:[%s877_s18 + $0x5f] sm:$0x1] %vm83_vm2, %v249_v59 }
  0xd7   : > { %267 = vst.msk [vmem:[%s877_s18 + $0x7f] sm:$0x1] %vm92_vm3, %v263_v56  ;;  %266 = vst.msk [vmem:[%s877_s18 + $0x5f] sm:$0x1] %vm92_vm3, %v262_v57 }
  0xd8 PF: > { %p623_p5 = scmp.ne.s32.totalorder %s1338_s6, 1 }
  0xd9   : > { %s624_s19 = sadd.s32 (!%p623_p5), 4294967295, %s1340_s8  ;;  %s1002_s20 = sshll.u32 (!%p623_p5), %s714_s4, 7  ;;  %vm306_vm6 = vcmask (!%p623_p5), 261120   ;;  %vm310_vm7 = vcmask (!%p623_p5), 259072   ;;  %vm283_vm8 = vcmask (!%p623_p5), 253952  }
  0xda   : > { %271 = sbr.rel (%p623_p5) target bundleno = 237 (0xed), region = 28  ;;  %p273_p6 = scmp.gt.s32.totalorder (!%p623_p5), %s624_s19, 0 }
  0xdb   : > { %s288_s21 = sadd.s32 (!%p623_p5), %s1340_s8, %s1002_s20  ;;  %s324_s22 = sadd.s32 (!%p623_p5), 30, %s1340_s8 }
  0xdc   : > { %p1009_p7 = scmp.lt.s32.totalorder (!%p623_p5), %s324_s22, 31  ;;  %s1014_s25 = scalar_lea.vmem (!%p623_p5), [#allocation4], %s288_s21 }
  0xdd   : > { %v290_v60 = vld [vmem:[%s1014_s25] sm:$0xff] (!%p623_p5)  ;;  %v291_v61 = vld [vmem:[%s1014_s25 + $0x8] sm:$0xff] (!%p623_p5)  ;;  %v292_v62 = vld [vmem:[%s1014_s25 + $0x10] sm:$0xff] (!%p623_p5)  ;;  %s1020_s26 = scalar_lea.vmem (!%p623_p5), [#allocation7], %s1002_s20 }
  0xde   : > { %307 = vst.msk [vmem:[%s1020_s26 + $0x1] sm:$0xff] (!%p623_p5), %vm306_vm6, %v290_v60  ;;  %308 = vst.msk [vmem:[%s1020_s26 + $0x9] sm:$0xff] (!%p623_p5), %vm306_vm6, %v291_v61  ;;  %v293_v63 = vld [vmem:[%s1014_s25 + $0x18] sm:$0x3f] (!%p623_p5)  ;;  %v294_v0 = vld [vmem:[%s1014_s25 + $0x20] sm:$0xff] (!%p623_p5) }
  0xdf   : > { %309 = vst.msk [vmem:[%s1020_s26 + $0x11] sm:$0xff] (!%p623_p5), %vm306_vm6, %v292_v62  ;;  %v295_v1 = vld [vmem:[%s1014_s25 + $0x28] sm:$0xff] (!%p623_p5)  ;;  %312 = vst.msk [vmem:[%s1020_s26 + $0x21] sm:$0xff] (!%p623_p5), %vm306_vm6, %v294_v0  ;;  %v296_v6 = vld [vmem:[%s1014_s25 + $0x30] sm:$0xff] (!%p623_p5) }
  0xe0   : > { %311 = vst.msk [vmem:[%s1020_s26 + $0x19] sm:$0x3f] (!%p623_p5), %vm310_vm7, %v293_v63  ;;  %v297_v7 = vld [vmem:[%s1014_s25 + $0x38] sm:$0x3f] (!%p623_p5)  ;;  %v298_v8 = vld [vmem:[%s1014_s25 + $0x40] sm:$0xff] (!%p623_p5)  ;;  %v299_v9 = vld [vmem:[%s1014_s25 + $0x48] sm:$0xff] (!%p623_p5) }
  0xe1   : > { %s1346_s19 = smov (!%p273_p6, %s624_s19), 0  ;;  %313 = vst.msk [vmem:[%s1020_s26 + $0x29] sm:$0xff] %vm306_vm6, %v295_v1  ;;  %s1348_s22 = smov (!%p1009_p7, %s324_s22), 31  ;;  %314 = vst.msk [vmem:[%s1020_s26 + $0x31] sm:$0xff] %vm306_vm6, %v296_v6  ;;  %v300_v10 = vld [vmem:[%s1014_s25 + $0x50] sm:$0xff]  ;;  %v302_v12 = vld [vmem:[%s1014_s25 + $0x60] sm:$0xff] }
  0xe2   : > { %s276_s24 = sadd.s32 %s1002_s20, %s1346_s19  ;;  %315 = vst.msk [vmem:[%s1020_s26 + $0x39] sm:$0x3f] %vm310_vm7, %v297_v7  ;;  %v301_v11 = vld [vmem:[%s1014_s25 + $0x58] sm:$0x3f]  ;;  %v303_v13 = vld [vmem:[%s1014_s25 + $0x68] sm:$0xff]  ;;  %s327_s0 = sadd.s32 %s1002_s20, %s1348_s22  ;;  %v304_v14 = vld [vmem:[%s1014_s25 + $0x70] sm:$0xff] }
  0xe3   : > { %s277_s27 = scalar_lea.vmem [#allocation4], %s276_s24  ;;  %316 = vst.msk [vmem:[%s1020_s26 + $0x41] sm:$0xff] %vm306_vm6, %v298_v8  ;;  %317 = vst.msk [vmem:[%s1020_s26 + $0x49] sm:$0xff] %vm306_vm6, %v299_v9  ;;  %v305_v15 = vld [vmem:[%s1014_s25 + $0x78] sm:$0x3f]  ;;  %s328_s30 = scalar_lea.vmem [#allocation4], %s327_s0 }
  0xe4   : > { %v278_v2 = vld [vmem:[%s277_s27] sm:$0x1]  ;;  %318 = vst.msk [vmem:[%s1020_s26 + $0x51] sm:$0xff] %vm306_vm6, %v300_v10  ;;  %320 = vst.msk [vmem:[%s1020_s26 + $0x61] sm:$0xff] %vm306_vm6, %v302_v12 }
  0xe5   : > { %v279_v3 = vld [vmem:[%s277_s27 + $0x20] sm:$0x1]  ;;  %284 = vst.msk [vmem:[%s1020_s26] sm:$0x1] %vm283_vm8, %v278_v2 }
  0xe6   : > { %v280_v4 = vld [vmem:[%s277_s27 + $0x40] sm:$0x1]  ;;  %285 = vst.msk [vmem:[%s1020_s26 + $0x20] sm:$0x1] %vm283_vm8, %v279_v3 }
  0xe7   : > { %286 = vst.msk [vmem:[%s1020_s26 + $0x40] sm:$0x1] %vm283_vm8, %v280_v4  ;;  %v281_v5 = vld [vmem:[%s277_s27 + $0x60] sm:$0x1] }
  0xe8   : > { %287 = vst.msk [vmem:[%s1020_s26 + $0x60] sm:$0x1] %vm283_vm8, %v281_v5  ;;  %v329_v16 = vld [vmem:[%s328_s30] sm:$0x1] }
  0xe9   : > { %319 = vst.msk [vmem:[%s1020_s26 + $0x59] sm:$0x3f] %vm310_vm7, %v301_v11  ;;  %323 = vst.msk [vmem:[%s1020_s26 + $0x79] sm:$0x3f] %vm310_vm7, %v305_v15  ;;  %v330_v17 = vld [vmem:[%s328_s30 + $0x20] sm:$0x1] }
  0xea   : > { %321 = vst.msk [vmem:[%s1020_s26 + $0x69] sm:$0xff] %vm306_vm6, %v303_v13  ;;  %322 = vst.msk [vmem:[%s1020_s26 + $0x71] sm:$0xff] %vm306_vm6, %v304_v14  ;;  %v331_v18 = vld [vmem:[%s328_s30 + $0x40] sm:$0x1] }
  0xeb   : > { %333 = vst.msk [vmem:[%s1020_s26 + $0x1f] sm:$0x1] %vm283_vm8, %v329_v16  ;;  %334 = vst.msk [vmem:[%s1020_s26 + $0x3f] sm:$0x1] %vm283_vm8, %v330_v17  ;;  %v332_v19 = vld [vmem:[%s328_s30 + $0x60] sm:$0x1] }
  0xec   : > { %335 = vst.msk [vmem:[%s1020_s26 + $0x5f] sm:$0x1] %vm283_vm8, %v331_v18  ;;  %336 = vst.msk [vmem:[%s1020_s26 + $0x7f] sm:$0x1] %vm283_vm8, %v332_v19 }
  0xed PF: > { %p626_p8 = scmp.lt.s32.totalorder %s1338_s6, 2 }
  0xee   : > { %s1090_s3 = sshll.u32 (!%p626_p8), %s714_s4, 7  ;;  %s627_s7 = sadd.s32 (!%p626_p8), 4294967295, %s1340_s8  ;;  %vm464_vm9 = vcmask (!%p626_p8), 252928   ;;  %vm498_vm10 = vcmask (!%p626_p8), 261368   ;;  %vm368_vm11 = vcmask (!%p626_p8), 245760   ;;  %vm377_vm12 = vcmask (!%p626_p8), 254200  }
  0xef   : > { %340 = sbr.rel (%p626_p8) target bundleno = 408 (0x198), region = 32  ;;  %s382_s5 = sadd.s32 (!%p626_p8), %s1340_s8, %s1090_s3  ;;  %vm468_vm13 = vcmask (!%p626_p8), 250880   ;;  %vm502_vm14 = vcmask (!%p626_p8), 259320  }
  0xf0   : > { %s1095_s1 = scalar_lea.vmem (!%p626_p8), [#allocation4], %s382_s5  ;;  %p342_p9 = scmp.gt.s32.totalorder (!%p626_p8), %s627_s7, 0 }
  0xf1   : > { %v1098_v20 = vld [vmem:[%s1095_s1 + $0x8] sm:$0xff] (!%p626_p8)  ;;  %v1101_v21 = vld [vmem:[%s1095_s1] sm:$0xff] (!%p626_p8)  ;;  %s721_s6 = smov (!%p626_p8), 127   ;;  %v387_v26 = vld [vmem:[%s1095_s1 + $0x18] sm:$0x3f] (!%p626_p8)  ;;  %s516_s11 = sadd.s32 (!%p626_p8), 30, %s1340_s8 }
  0xf2   : > { %418 = vrot.lane.b32.xlu1 (!%p626_p8), %v1098_v20, %s721_s6  ;;  %416 = vrot.lane.b32.xlu0 (!%p626_p8), %v1101_v21, %s721_s6  ;;  %v1120_v27 = vld [vmem:[%s1095_s1 + $0x10] sm:$0xff] (!%p626_p8)  ;;  %v1126_v28 = vld [vmem:[%s1095_s1 + $0x28] sm:$0xff] (!%p626_p8)  ;;  %p517_p10 = scmp.lt.s32.totalorder (!%p626_p8), %s516_s11, 31  ;;  %s1189_s13 = scalar_lea.vmem (!%p626_p8), [#allocation7], %s1090_s3 }
  0xf3   : > { %v1129_v29 = vld [vmem:[%s1095_s1 + $0x20] sm:$0xff] (!%p626_p8)  ;;  %v391_v30 = vld [vmem:[%s1095_s1 + $0x38] sm:$0x3f] (!%p626_p8)  ;;  %v1137_v31 = vld [vmem:[%s1095_s1 + $0x30] sm:$0xff] (!%p626_p8) }
  0xf4   : > { %v1144_v32 = vld [vmem:[%s1095_s1 + $0x48] sm:$0xff] (!%p626_p8)  ;;  %v1147_v33 = vld [vmem:[%s1095_s1 + $0x40] sm:$0xff] (!%p626_p8)  ;;  %v395_v34 = vld [vmem:[%s1095_s1 + $0x58] sm:$0x3f] (!%p626_p8) }
  0xf5   : > { %v1155_v35 = vld [vmem:[%s1095_s1 + $0x50] sm:$0xff] (!%p626_p8)  ;;  %v1161_v36 = vld [vmem:[%s1095_s1 + $0x68] sm:$0xff] (!%p626_p8)  ;;  %v1164_v37 = vld [vmem:[%s1095_s1 + $0x60] sm:$0xff] (!%p626_p8) }
  0xf6   : > { %s1350_s7 = smov (!%p342_p9, %s627_s7), 0  ;;  %s1352_s11 = smov (!%p517_p10, %s516_s11), 31  ;;  %v399_v38 = vld [vmem:[%s1095_s1 + $0x78] sm:$0x3f]  ;;  %v1173_v39 = vld [vmem:[%s1095_s1 + $0x70] sm:$0xff] }
  0xf7   : > { %s345_s9 = sadd.s32 %s1090_s3, %s1350_s7  ;;  %s519_s8 = sadd.s32 %s1090_s3, %s1352_s11  ;;  %v485_v54 = vld [vmem:[%s1095_s1 + $0x18] sm:$0x3f] }
  0xf8   : > { %s1108_s10 = scalar_lea.vmem [#allocation4], %s345_s9  ;;  %s1178_s12 = scalar_lea.vmem [#allocation4], %s519_s8  ;;  %v489_v59 = vld [vmem:[%s1095_s1 + $0x38] sm:$0x3f] }
  0xf9   : > { %v349_v22 = vld [vmem:[%s1108_s10 + $0x40] sm:$0x1]  ;;  %v493_v0 = vld [vmem:[%s1095_s1 + $0x58] sm:$0x3f] }
  0xfa   : > { %v347_v23 = vld [vmem:[%s1108_s10] sm:$0x1]  ;;  %359 = vrot.lane.b32.xlu1 %v349_v22, %s721_s6  ;;  %v497_v5 = vld [vmem:[%s1095_s1 + $0x78] sm:$0x3f] }
  0xfb   : > { %355 = vrot.lane.b32.xlu0 %v347_v23, %s721_s6  ;;  %v350_v24 = vld [vmem:[%s1108_s10 + $0x60] sm:$0x1] }
  0xfc   : > { %v348_v25 = vld [vmem:[%s1108_s10 + $0x20] sm:$0x1] }
  0xfd   : > { %v522_v40 = vld [vmem:[%s1178_s12 + $0x20] sm:$0x1] }
  0xfe   : > { %361 = vrot.lane.b32.xlu1 %v350_v24, %s721_s6  ;;  %v521_v41 = vld [vmem:[%s1178_s12] sm:$0x1] }
  0xff   : > { %357 = vrot.lane.b32.xlu0 %v348_v25, %s721_s6  ;;  %v524_v42 = vld [vmem:[%s1178_s12 + $0x60] sm:$0x1] }
 0x100   : > { %v523_v43 = vld [vmem:[%s1178_s12 + $0x40] sm:$0x1] }
 0x101   : > { %v375_v46 = vld [vmem:[%s1108_s10 + $0x40] sm:$0x1] }
 0x102   : > { %422 = vrot.lane.b32.xlu1 %v387_v26, %s721_s6  ;;  %v373_v47 = vld [vmem:[%s1108_s10] sm:$0x1] }
 0x103   : > { %420 = vrot.lane.b32.xlu0 %v1120_v27, %s721_s6  ;;  %v376_v50 = vld [vmem:[%s1108_s10 + $0x60] sm:$0x1] }
 0x104   : > { %v374_v51 = vld [vmem:[%s1108_s10 + $0x20] sm:$0x1] }
 0x105   : > { %v546_v8 = vld [vmem:[%s1178_s12 + $0x20] sm:$0x1] }
 0x106   : > { %426 = vrot.lane.b32.xlu1 %v1126_v28, %s721_s6  ;;  %v545_v9 = vld [vmem:[%s1178_s12] sm:$0x1] }
 0x107   : > { %424 = vrot.lane.b32.xlu0 %v1129_v29, %s721_s6  ;;  %v548_v12 = vld [vmem:[%s1178_s12 + $0x60] sm:$0x1] }
 0x108   : > { %v547_v13 = vld [vmem:[%s1178_s12 + $0x40] sm:$0x1] }
 0x10a   : > { %430 = vrot.lane.b32.xlu1 %v391_v30, %s721_s6 }
 0x10b   : > { %428 = vrot.lane.b32.xlu0 %v1137_v31, %s721_s6 }
 0x10e   : > { %434 = vrot.lane.b32.xlu1 %v1144_v32, %s721_s6 }
 0x10f   : > { %432 = vrot.lane.b32.xlu0 %v1147_v33, %s721_s6 }
 0x112   : > { %438 = vrot.lane.b32.xlu1 %v395_v34, %s721_s6 }
 0x113   : > { %436 = vrot.lane.b32.xlu0 %v1155_v35, %s721_s6 }
 0x116   : > { %442 = vrot.lane.b32.xlu1 %v1161_v36, %s721_s6 }
 0x117   : > { %440 = vrot.lane.b32.xlu0 %v1164_v37, %s721_s6 }
 0x11a   : > { %446 = vrot.lane.b32.xlu1 %v399_v38, %s721_s6 }
 0x11b   : > { %444 = vrot.lane.b32.xlu0 %v1173_v39, %s721_s6 }
 0x11e   : > { %531 = vrot.lane.b32.xlu1 %v522_v40, %s721_s6 }
 0x11f   : > { %529 = vrot.lane.b32.xlu0 %v521_v41, %s721_s6 }
 0x122   : > { %535 = vrot.lane.b32.xlu1 %v524_v42, %s721_s6 }
 0x123   : > { %533 = vrot.lane.b32.xlu0 %v523_v43, %s721_s6 }
 0x164   : > { %v419_v44 = vpop.permute.xlu1 %418  ;;  %v417_v45 = vpop.permute.xlu0 %416 }
 0x165   : > { %466 = vst.msk [vmem:[%s1189_s13 + $0x9] sm:$0xff] %vm464_vm9, %v419_v44  ;;  %465 = vst.msk [vmem:[%s1189_s13 + $0x1] sm:$0xff] %vm464_vm9, %v417_v45 }
 0x166   : > { %500 = vst.msk [vmem:[%s1189_s13 + $0x9] sm:$0xff] %vm498_vm10, %v1098_v20  ;;  %499 = vst.msk [vmem:[%s1189_s13 + $0x1] sm:$0xff] %vm498_vm10, %v1101_v21 }
 0x16c   : > { %v360_v48 = vpop.permute.xlu1 %359 }
 0x16d   : > { %v356_v49 = vpop.permute.xlu0 %355  ;;  %371 = vst.msk [vmem:[%s1189_s13 + $0x40] sm:$0x1] %vm368_vm11, %v360_v48 }
 0x16e   : > { %369 = vst.msk [vmem:[%s1189_s13] sm:$0x1] %vm368_vm11, %v356_v49 }
 0x16f   : > { %380 = vst.msk [vmem:[%s1189_s13 + $0x40] sm:$0x1] %vm377_vm12, %v375_v46  ;;  %378 = vst.msk [vmem:[%s1189_s13] sm:$0x1] %vm377_vm12, %v373_v47 }
 0x170   : > { %v362_v52 = vpop.permute.xlu1 %361 }
 0x171   : > { %v358_v53 = vpop.permute.xlu0 %357  ;;  %372 = vst.msk [vmem:[%s1189_s13 + $0x60] sm:$0x1] %vm368_vm11, %v362_v52 }
 0x172   : > { %370 = vst.msk [vmem:[%s1189_s13 + $0x20] sm:$0x1] %vm368_vm11, %v358_v53 }
 0x173   : > { %381 = vst.msk [vmem:[%s1189_s13 + $0x60] sm:$0x1] %vm377_vm12, %v376_v50  ;;  %379 = vst.msk [vmem:[%s1189_s13 + $0x20] sm:$0x1] %vm377_vm12, %v374_v51 }
 0x174   : > { %v423_v55 = vpop.permute.xlu1 %422 }
 0x175   : > { %v421_v56 = vpop.permute.xlu0 %420  ;;  %469 = vst.msk [vmem:[%s1189_s13 + $0x19] sm:$0x3f] %vm468_vm13, %v423_v55 }
 0x176   : > { %467 = vst.msk [vmem:[%s1189_s13 + $0x11] sm:$0xff] %vm464_vm9, %v421_v56 }
 0x177   : > { %503 = vst.msk [vmem:[%s1189_s13 + $0x19] sm:$0x3f] %vm502_vm14, %v485_v54 }
 0x178   : > { %501 = vst.msk [vmem:[%s1189_s13 + $0x11] sm:$0xff] %vm498_vm10, %v1120_v27  ;;  %v427_v57 = vpop.permute.xlu1 %426 }
 0x179   : > { %v425_v58 = vpop.permute.xlu0 %424  ;;  %471 = vst.msk [vmem:[%s1189_s13 + $0x29] sm:$0xff] %vm464_vm9, %v427_v57 }
 0x17a   : > { %470 = vst.msk [vmem:[%s1189_s13 + $0x21] sm:$0xff] %vm464_vm9, %v425_v58 }
 0x17b   : > { %505 = vst.msk [vmem:[%s1189_s13 + $0x29] sm:$0xff] %vm498_vm10, %v1126_v28  ;;  %504 = vst.msk [vmem:[%s1189_s13 + $0x21] sm:$0xff] %vm498_vm10, %v1129_v29 }
 0x17c   : > { %v431_v60 = vpop.permute.xlu1 %430 }
 0x17d   : > { %v429_v61 = vpop.permute.xlu0 %428  ;;  %473 = vst.msk [vmem:[%s1189_s13 + $0x39] sm:$0x3f] %vm468_vm13, %v431_v60 }
 0x17e   : > { %472 = vst.msk [vmem:[%s1189_s13 + $0x31] sm:$0xff] %vm464_vm9, %v429_v61 }
 0x17f   : > { %507 = vst.msk [vmem:[%s1189_s13 + $0x39] sm:$0x3f] %vm502_vm14, %v489_v59 }
 0x180   : > { %506 = vst.msk [vmem:[%s1189_s13 + $0x31] sm:$0xff] %vm498_vm10, %v1137_v31  ;;  %v435_v62 = vpop.permute.xlu1 %434 }
 0x181   : > { %v433_v63 = vpop.permute.xlu0 %432  ;;  %475 = vst.msk [vmem:[%s1189_s13 + $0x49] sm:$0xff] %vm464_vm9, %v435_v62 }
 0x182   : > { %474 = vst.msk [vmem:[%s1189_s13 + $0x41] sm:$0xff] %vm464_vm9, %v433_v63 }
 0x183   : > { %509 = vst.msk [vmem:[%s1189_s13 + $0x49] sm:$0xff] %vm498_vm10, %v1144_v32  ;;  %508 = vst.msk [vmem:[%s1189_s13 + $0x41] sm:$0xff] %vm498_vm10, %v1147_v33 }
 0x184   : > { %v439_v1 = vpop.permute.xlu1 %438 }
 0x185   : > { %v437_v2 = vpop.permute.xlu0 %436  ;;  %477 = vst.msk [vmem:[%s1189_s13 + $0x59] sm:$0x3f] %vm468_vm13, %v439_v1 }
 0x186   : > { %476 = vst.msk [vmem:[%s1189_s13 + $0x51] sm:$0xff] %vm464_vm9, %v437_v2 }
 0x187   : > { %511 = vst.msk [vmem:[%s1189_s13 + $0x59] sm:$0x3f] %vm502_vm14, %v493_v0 }
 0x188   : > { %510 = vst.msk [vmem:[%s1189_s13 + $0x51] sm:$0xff] %vm498_vm10, %v1155_v35  ;;  %v443_v3 = vpop.permute.xlu1 %442 }
 0x189   : > { %v441_v4 = vpop.permute.xlu0 %440  ;;  %479 = vst.msk [vmem:[%s1189_s13 + $0x69] sm:$0xff] %vm464_vm9, %v443_v3 }
 0x18a   : > { %478 = vst.msk [vmem:[%s1189_s13 + $0x61] sm:$0xff] %vm464_vm9, %v441_v4 }
 0x18b   : > { %513 = vst.msk [vmem:[%s1189_s13 + $0x69] sm:$0xff] %vm498_vm10, %v1161_v36  ;;  %512 = vst.msk [vmem:[%s1189_s13 + $0x61] sm:$0xff] %vm498_vm10, %v1164_v37 }
 0x18c   : > { %v447_v6 = vpop.permute.xlu1 %446 }
 0x18d   : > { %v445_v7 = vpop.permute.xlu0 %444  ;;  %481 = vst.msk [vmem:[%s1189_s13 + $0x79] sm:$0x3f] %vm468_vm13, %v447_v6 }
 0x18e   : > { %480 = vst.msk [vmem:[%s1189_s13 + $0x71] sm:$0xff] %vm464_vm9, %v445_v7 }
 0x18f   : > { %515 = vst.msk [vmem:[%s1189_s13 + $0x79] sm:$0x3f] %vm502_vm14, %v497_v5 }
 0x190   : > { %514 = vst.msk [vmem:[%s1189_s13 + $0x71] sm:$0xff] %vm498_vm10, %v1173_v39  ;;  %v532_v10 = vpop.permute.xlu1 %531 }
 0x191   : > { %v530_v11 = vpop.permute.xlu0 %529  ;;  %542 = vst.msk [vmem:[%s1189_s13 + $0x3f] sm:$0x1] %vm368_vm11, %v532_v10 }
 0x192   : > { %541 = vst.msk [vmem:[%s1189_s13 + $0x1f] sm:$0x1] %vm368_vm11, %v530_v11 }
 0x193   : > { %550 = vst.msk [vmem:[%s1189_s13 + $0x3f] sm:$0x1] %vm377_vm12, %v546_v8  ;;  %549 = vst.msk [vmem:[%s1189_s13 + $0x1f] sm:$0x1] %vm377_vm12, %v545_v9 }
 0x194   : > { %v536_v14 = vpop.permute.xlu1 %535 }
 0x195   : > { %v534_v15 = vpop.permute.xlu0 %533  ;;  %544 = vst.msk [vmem:[%s1189_s13 + $0x7f] sm:$0x1] %vm368_vm11, %v536_v14 }
 0x196   : > { %543 = vst.msk [vmem:[%s1189_s13 + $0x5f] sm:$0x1] %vm368_vm11, %v534_v15 }
 0x197   : > { %552 = vst.msk [vmem:[%s1189_s13 + $0x7f] sm:$0x1] %vm377_vm12, %v548_v12  ;;  %551 = vst.msk [vmem:[%s1189_s13 + $0x5f] sm:$0x1] %vm377_vm12, %v547_v13 }
 0x198 PF: > { %s33_s4 = sadd.s32 1, %s714_s4  }
 0x199   : > { %p30_p11 = scmp.ge.s32.totalorder %s33_s4, 5  }
 0x19a   :  { %s722_s14 = smov (%p30_p11), [#allocation7]  }
 0x19b   :  { %32 = sbr.rel (!%p30_p11) target bundleno = 32 (0x20), region = 63  ;;  %s558_s15 = sshll.u32 (%p30_p11), %s722_s14, 4  ;;  %s559_s15 = int_to_ptr.vmem [resolvable:$true] %s558_s15 }
 0x19c   :  { %s680_s16 = scalar_lea.vmem (%p30_p11), %s559_s15, 10240  ;;  %p685_p13 = scmp.lt.s32.totalorder (%p30_p11), %s559_s15, %s559_s15 }
 0x19d   :  { %p681_p12 = scmp.ne.s32.totalorder (%p30_p11), %s559_s15, %s680_s16  ;;  %p686_p0 = scmp.lt.s32.totalorder (%p30_p11), %s680_s16, %s680_s16 }
 0x19f   :  { %p687_p1 = por (%p30_p11), %p686_p0, %p685_p13 }
 0x1a1   :  { %p688_p2 = pnand (%p30_p11), %p687_p1, %p681_p12 }
 0x1a3   :  { %691 = shalt.err (!%p688_p2)
}
 0x1a4   :  { %s692_s19 = scalar_lea.hbm %s1331_s2, 10240 }
 0x1a5   :  { %p693_p3 = scmp.ne.s32.totalorder %s1331_s2, %s692_s19  ;;  %p696_p4 = scmp.lt.u32.totalorder %s692_s19, %s1331_s2 }
 0x1a7   :  { %p698_p5 = pnand %p696_p4, %p693_p3 }
 0x1a9   :  { %701 = shalt.err (!%p698_p5)
}
 0x1aa   :  { %564 = dma.vmem_to_hbm [thread:$0]  %s559_s15, 10240, %s1331_s2, [#allocation6], %s718_s28, %s718_s28, %s719_s29  }
 0x1ab   :  { %710 = dma.done.wait [#allocation6], 10240  }
 0x1ac   :  { %711 = vsyncadd [#allocation6], 4294957056 }
 0x1ad   :  { %568 = vsyncpa [#allocation5], 1 }
 0x1ae   :  { %569 = vsyncpa [#allocation6], 1 }

</bundles_post_ra>
